<compile_context>
chip_gen: v6e
topology: v6e:2x2x1
jax: 0.10.0
libtpu: 0.0.40
codegen_flags: <defaults>
</compile_context>

<pallas_src>
import functools

import jax
import jax.numpy as jnp
from jax.experimental import pallas as pl
from jax.experimental.pallas import tpu as pltpu

_LANE = 128


def _round_up(x, m):
    return (x + m - 1) // m * m


def _keep_mask_x2(seed_u32, layer_idx, shape, row_offset_u32):
    """Bernoulli(0.5) dropout mask with the 1/(1-p)=2 scale folded in (0.0 or 2.0).

    Deterministic counter-based hash of (seed, layer, global_row, col); pure
    VPU integer ops, so it works on TPU and in interpret mode alike.
    """
    rows = jax.lax.broadcasted_iota(jnp.int32, shape, 0).astype(jnp.uint32)
    cols = jax.lax.broadcasted_iota(jnp.int32, shape, 1).astype(jnp.uint32)
    rows = rows + row_offset_u32
    x = (rows * jnp.uint32(0x85EBCA77)
         + cols * jnp.uint32(0xC2B2AE3D)
         + (seed_u32 ^ (jnp.uint32(layer_idx + 1) * jnp.uint32(0x9E3779B1))))
    # murmur3-style finalizer mix
    x = x ^ (x >> jnp.uint32(16))
    x = x * jnp.uint32(0x85EBCA6B)
    x = x ^ (x >> jnp.uint32(13))
    x = x * jnp.uint32(0xC2B2AE35)
    x = x ^ (x >> jnp.uint32(16))
    # use a mid/high-order bit (not bit 0) for the keep decision
    bit = (x >> jnp.uint32(17)) & jnp.uint32(1)
    return jnp.where(bit == jnp.uint32(1), 2.0, 0.0).astype(jnp.float32)


def _prenet_fused_kernel(n_layers, tm, seed_ref, x_ref, *refs):
    """All Prenet layers fused; intermediates stay in VMEM/vregs.

    refs = (w1, b1, w2, b2, ..., out_ref); weights are (K, N) = W^T of PyTorch.
    """
    o_ref = refs[-1]
    wb = refs[:-1]
    seed_u32 = seed_ref[0].astype(jnp.uint32)
    row_off = (pl.program_id(0) * tm).astype(jnp.uint32)

    h = x_ref[...]                                   # bf16 tile (tm, K0)
    for layer in range(n_layers):
        w_ref = wb[2 * layer]
        b_ref = wb[2 * layer + 1]
        y = jnp.dot(h.astype(jnp.bfloat16), w_ref[...],
                    preferred_element_type=jnp.float32)     # MXU, f32 acc
        y = jnp.maximum(y + b_ref[...], 0.0)                 # bias + ReLU (VPU)
        h = y * _keep_mask_x2(seed_u32, layer, y.shape, row_off)  # dropout*2
    o_ref[...] = h.astype(o_ref.dtype)


def init_prenet_params(key, in_dim, sizes):
    """PyTorch-Linear-style init: U(-1/sqrt(fan_in), 1/sqrt(fan_in)).

    Weights stored as (in_dim, out_dim) == W^T of PyTorch's (out_dim, in_dim).
    """
    in_sizes = [in_dim] + list(sizes[:-1])
    params = []
    for in_size, out_size in zip(in_sizes, sizes):
        key, kw, kb = jax.random.split(key, 3)
        bound = 1.0 / (in_size ** 0.5)
        w = jax.random.uniform(kw, (in_size, out_size), jnp.float32, -bound, bound)
        b = jax.random.uniform(kb, (1, out_size), jnp.float32, -bound, bound)
        params.append((w, b))
    return params


def prenet_forward(x, params, seed=0, tm=512):
    """Prenet training-mode forward. x: (B, T, in_dim) -> (B, T, sizes[-1])."""
    B, T, D = x.shape
    M = B * T
    n_layers = len(params)

    # Pad feature dims to lane multiples (128): dense MXU feed + unmasked stores.
    dims = [D] + [w.shape[1] for (w, _) in params]
    dims_p = [_round_up(d, _LANE) for d in dims]

    # Tile M; pad rows so the grid divides exactly (padded rows are discarded).
    m_pad = _round_up(M, 16)
    tile_m = min(tm, m_pad)
    m_pad = _round_up(m_pad, tile_m)
    n_tiles = m_pad // tile_m

    x2 = jnp.pad(x.reshape(M, D).astype(jnp.bfloat16),
                 ((0, m_pad - M), (0, dims_p[0] - D)))

    flat_wb = []
    in_specs = [pl.BlockSpec((tile_m, dims_p[0]), lambda i, s: (i, 0))]
    for li, (w, b) in enumerate(params):
        kp, np_ = dims_p[li], dims_p[li + 1]
        wp = jnp.pad(w.astype(jnp.bfloat16),
                     ((0, kp - w.shape[0]), (0, np_ - w.shape[1])))
        bp = jnp.pad(b.reshape(1, -1).astype(jnp.float32),
                     ((0, 0), (0, np_ - b.shape[-1])))
        flat_wb += [wp, bp]
        in_specs += [pl.BlockSpec((kp, np_), lambda i, s: (0, 0)),
                     pl.BlockSpec((1, np_), lambda i, s: (0, 0))]

    out_p = dims_p[-1]
    kernel = functools.partial(_prenet_fused_kernel, n_layers, tile_m)
    seed_arr = jnp.asarray([seed], dtype=jnp.int32)

    out = pl.pallas_call(
        kernel,
        out_shape=jax.ShapeDtypeStruct((m_pad, out_p), jnp.float32),
        grid_spec=pltpu.PrefetchScalarGridSpec(
            num_scalar_prefetch=1,               # seed -> SMEM
            grid=(n_tiles,),
            in_specs=in_specs,
            out_specs=pl.BlockSpec((tile_m, out_p), lambda i, s: (i, 0)),
        ),
        compiler_params=pltpu.CompilerParams(
            dimension_semantics=("parallel",),   # row tiles shard across TCs
            vmem_limit_bytes=32 * 1024 * 1024,   # safe on v5e/v6e/v7x
        ),
    )(seed_arr, x2, *flat_wb)

    return out[:M, :dims[-1]].reshape(B, T, dims[-1])


if __name__ == "__main__":
    key = jax.random.PRNGKey(0)
    k_x, k_p = jax.random.split(key)

    B, T, in_dim = 2, 8, 32
    sizes = [32, 32]

    x = jax.random.normal(k_x, (B, T, in_dim), dtype=jnp.float32)
    params = init_prenet_params(k_p, in_dim, sizes)

    out = prenet_forward(x, params, seed=1234)
    out = jax.block_until_ready(out)

    assert out.shape == (B, T, sizes[-1])
    assert out.dtype == jnp.float32
    # Dropout(p=0.5) after ReLU: every output is either 0 or 2*relu(linear) >= 0.
    assert bool(jnp.all(out >= 0.0))
    assert bool(jnp.all(jnp.isfinite(out)))

    print("KERNEL_OK")
</pallas_src>

<mosaic_0001>
module attributes {stable_mosaic.version = 11 : i64} {
  func.func @_prenet_fused_kernel(%arg0: i32, %arg1: memref<1xi32, #tpu.memory_space<smem>>, %arg2: memref<16x128xbf16, #tpu.memory_space<vmem>>, %arg3: memref<128x128xbf16, #tpu.memory_space<vmem>>, %arg4: memref<1x128xf32, #tpu.memory_space<vmem>>, %arg5: memref<128x128xbf16, #tpu.memory_space<vmem>>, %arg6: memref<1x128xf32, #tpu.memory_space<vmem>>, %arg7: memref<16x128xf32, #tpu.memory_space<vmem>>) attributes {dimension_semantics = [#tpu.dimension_semantics<parallel>], iteration_bounds = array<i64: 1>, scalar_prefetch = 1 : i64, scratch_operands = 0 : i64, tpu.core_type = #tpu.core_type<tc>, window_params = [{transform_indices = @transform_0, window_bounds = array<i64: 16, 128>}, {pipeline_mode = #tpu.pipeline_mode<synchronous>, transform_indices = @transform_1, window_bounds = array<i64: 128, 128>}, {pipeline_mode = #tpu.pipeline_mode<synchronous>, transform_indices = @transform_2, window_bounds = array<i64: 1, 128>}, {pipeline_mode = #tpu.pipeline_mode<synchronous>, transform_indices = @transform_3, window_bounds = array<i64: 128, 128>}, {pipeline_mode = #tpu.pipeline_mode<synchronous>, transform_indices = @transform_4, window_bounds = array<i64: 1, 128>}, {transform_indices = @transform_5, window_bounds = array<i64: 16, 128>}]} {
    %c0 = arith.constant 0 : index
    %0 = memref.load %arg1[%c0] : memref<1xi32, #tpu.memory_space<smem>>
    %c16_i32 = arith.constant 16 : i32
    %1 = arith.muli %arg0, %c16_i32 : i32
    %c0_0 = arith.constant 0 : index
    %c0_1 = arith.constant 0 : index
    %2 = vector.load %arg2[%c0_0, %c0_1] : memref<16x128xbf16, #tpu.memory_space<vmem>>, vector<16x128xbf16>
    %c0_2 = arith.constant 0 : index
    %c0_3 = arith.constant 0 : index
    %3 = vector.load %arg3[%c0_2, %c0_3] : memref<128x128xbf16, #tpu.memory_space<vmem>>, vector<128x128xbf16>
    %cst = arith.constant dense<0.000000e+00> : vector<16x128xf32>
    %4 = tpu.matmul %2, %3, %cst {dimension_numbers = #tpu.dot_dimension_numbers<[1], [0], [0], [1], [0, 0, 1, 1], [], []>} : vector<16x128xbf16>, vector<128x128xbf16>, vector<16x128xf32> -> vector<16x128xf32>
    %c0_4 = arith.constant 0 : index
    %c0_5 = arith.constant 0 : index
    %5 = vector.load %arg4[%c0_4, %c0_5] : memref<1x128xf32, #tpu.memory_space<vmem>>, vector<1x128xf32>
    %6 = vector.broadcast %5 : vector<1x128xf32> to vector<16x128xf32>
    %7 = arith.addf %4, %6 : vector<16x128xf32>
    %cst_6 = arith.constant 0.000000e+00 : f32
    %8 = vector.broadcast %cst_6 : f32 to vector<16x128xf32>
    %9 = arith.maximumf %7, %8 : vector<16x128xf32>
    %10 = tpu.iota {dimensions = array<i32: 0>} : vector<16x128xi32>
    %11 = tpu.iota {dimensions = array<i32: 1>} : vector<16x128xi32>
    %12 = vector.broadcast %1 : i32 to vector<16x128xi32>
    %13 = arith.addi %10, %12 : vector<16x128xi32>
    %c-2048144777_i32 = arith.constant -2048144777 : i32
    %14 = vector.broadcast %c-2048144777_i32 : i32 to vector<16x128xi32>
    %15 = arith.muli %13, %14 : vector<16x128xi32>
    %c-1028477379_i32 = arith.constant -1028477379 : i32
    %16 = vector.broadcast %c-1028477379_i32 : i32 to vector<16x128xi32>
    %17 = arith.muli %11, %16 : vector<16x128xi32>
    %18 = arith.addi %15, %17 : vector<16x128xi32>
    %c1_i32 = arith.constant 1 : i32
    %c-1640531535_i32 = arith.constant -1640531535 : i32
    %19 = arith.muli %c1_i32, %c-1640531535_i32 : i32
    %20 = arith.xori %0, %19 : i32
    %21 = vector.broadcast %20 : i32 to vector<16x128xi32>
    %22 = arith.addi %18, %21 : vector<16x128xi32>
    %c16_i32_7 = arith.constant 16 : i32
    %23 = vector.broadcast %c16_i32_7 : i32 to vector<16x128xi32>
    %24 = arith.shrui %22, %23 : vector<16x128xi32>
    %25 = arith.xori %22, %24 : vector<16x128xi32>
    %c-2048144789_i32 = arith.constant -2048144789 : i32
    %26 = vector.broadcast %c-2048144789_i32 : i32 to vector<16x128xi32>
    %27 = arith.muli %25, %26 : vector<16x128xi32>
    %c13_i32 = arith.constant 13 : i32
    %28 = vector.broadcast %c13_i32 : i32 to vector<16x128xi32>
    %29 = arith.shrui %27, %28 : vector<16x128xi32>
    %30 = arith.xori %27, %29 : vector<16x128xi32>
    %c-1028477387_i32 = arith.constant -1028477387 : i32
    %31 = vector.broadcast %c-1028477387_i32 : i32 to vector<16x128xi32>
    %32 = arith.muli %30, %31 : vector<16x128xi32>
    %c16_i32_8 = arith.constant 16 : i32
    %33 = vector.broadcast %c16_i32_8 : i32 to vector<16x128xi32>
    %34 = arith.shrui %32, %33 : vector<16x128xi32>
    %35 = arith.xori %32, %34 : vector<16x128xi32>
    %c17_i32 = arith.constant 17 : i32
    %36 = vector.broadcast %c17_i32 : i32 to vector<16x128xi32>
    %37 = arith.shrui %35, %36 : vector<16x128xi32>
    %c1_i32_9 = arith.constant 1 : i32
    %38 = vector.broadcast %c1_i32_9 : i32 to vector<16x128xi32>
    %39 = arith.andi %37, %38 : vector<16x128xi32>
    %c1_i32_10 = arith.constant 1 : i32
    %40 = vector.broadcast %c1_i32_10 : i32 to vector<16x128xi32>
    %41 = arith.cmpi eq, %39, %40 : vector<16x128xi32>
    %cst_11 = arith.constant 2.000000e+00 : f32
    %cst_12 = arith.constant 0.000000e+00 : f32
    %42 = vector.broadcast %cst_11 : f32 to vector<16x128xf32>
    %43 = vector.broadcast %cst_12 : f32 to vector<16x128xf32>
    %44 = arith.select %41, %42, %43 : vector<16x128xi1>, vector<16x128xf32>
    %45 = arith.mulf %9, %44 : vector<16x128xf32>
    %46 = arith.truncf %45 : vector<16x128xf32> to vector<16x128xbf16>
    %c0_13 = arith.constant 0 : index
    %c0_14 = arith.constant 0 : index
    %47 = vector.load %arg5[%c0_13, %c0_14] : memref<128x128xbf16, #tpu.memory_space<vmem>>, vector<128x128xbf16>
    %cst_15 = arith.constant dense<0.000000e+00> : vector<16x128xf32>
    %48 = tpu.matmul %46, %47, %cst_15 {dimension_numbers = #tpu.dot_dimension_numbers<[1], [0], [0], [1], [0, 0, 1, 1], [], []>} : vector<16x128xbf16>, vector<128x128xbf16>, vector<16x128xf32> -> vector<16x128xf32>
    %c0_16 = arith.constant 0 : index
    %c0_17 = arith.constant 0 : index
    %49 = vector.load %arg6[%c0_16, %c0_17] : memref<1x128xf32, #tpu.memory_space<vmem>>, vector<1x128xf32>
    %50 = vector.broadcast %49 : vector<1x128xf32> to vector<16x128xf32>
    %51 = arith.addf %48, %50 : vector<16x128xf32>
    %cst_18 = arith.constant 0.000000e+00 : f32
    %52 = vector.broadcast %cst_18 : f32 to vector<16x128xf32>
    %53 = arith.maximumf %51, %52 : vector<16x128xf32>
    %54 = tpu.iota {dimensions = array<i32: 0>} : vector<16x128xi32>
    %55 = tpu.iota {dimensions = array<i32: 1>} : vector<16x128xi32>
    %56 = vector.broadcast %1 : i32 to vector<16x128xi32>
    %57 = arith.addi %54, %56 : vector<16x128xi32>
    %c-2048144777_i32_19 = arith.constant -2048144777 : i32
    %58 = vector.broadcast %c-2048144777_i32_19 : i32 to vector<16x128xi32>
    %59 = arith.muli %57, %58 : vector<16x128xi32>
    %c-1028477379_i32_20 = arith.constant -1028477379 : i32
    %60 = vector.broadcast %c-1028477379_i32_20 : i32 to vector<16x128xi32>
    %61 = arith.muli %55, %60 : vector<16x128xi32>
    %62 = arith.addi %59, %61 : vector<16x128xi32>
    %c2_i32 = arith.constant 2 : i32
    %c-1640531535_i32_21 = arith.constant -1640531535 : i32
    %63 = arith.muli %c2_i32, %c-1640531535_i32_21 : i32
    %64 = arith.xori %0, %63 : i32
    %65 = vector.broadcast %64 : i32 to vector<16x128xi32>
    %66 = arith.addi %62, %65 : vector<16x128xi32>
    %c16_i32_22 = arith.constant 16 : i32
    %67 = vector.broadcast %c16_i32_22 : i32 to vector<16x128xi32>
    %68 = arith.shrui %66, %67 : vector<16x128xi32>
    %69 = arith.xori %66, %68 : vector<16x128xi32>
    %c-2048144789_i32_23 = arith.constant -2048144789 : i32
    %70 = vector.broadcast %c-2048144789_i32_23 : i32 to vector<16x128xi32>
    %71 = arith.muli %69, %70 : vector<16x128xi32>
    %c13_i32_24 = arith.constant 13 : i32
    %72 = vector.broadcast %c13_i32_24 : i32 to vector<16x128xi32>
    %73 = arith.shrui %71, %72 : vector<16x128xi32>
    %74 = arith.xori %71, %73 : vector<16x128xi32>
    %c-1028477387_i32_25 = arith.constant -1028477387 : i32
    %75 = vector.broadcast %c-1028477387_i32_25 : i32 to vector<16x128xi32>
    %76 = arith.muli %74, %75 : vector<16x128xi32>
    %c16_i32_26 = arith.constant 16 : i32
    %77 = vector.broadcast %c16_i32_26 : i32 to vector<16x128xi32>
    %78 = arith.shrui %76, %77 : vector<16x128xi32>
    %79 = arith.xori %76, %78 : vector<16x128xi32>
    %c17_i32_27 = arith.constant 17 : i32
    %80 = vector.broadcast %c17_i32_27 : i32 to vector<16x128xi32>
    %81 = arith.shrui %79, %80 : vector<16x128xi32>
    %c1_i32_28 = arith.constant 1 : i32
    %82 = vector.broadcast %c1_i32_28 : i32 to vector<16x128xi32>
    %83 = arith.andi %81, %82 : vector<16x128xi32>
    %c1_i32_29 = arith.constant 1 : i32
    %84 = vector.broadcast %c1_i32_29 : i32 to vector<16x128xi32>
    %85 = arith.cmpi eq, %83, %84 : vector<16x128xi32>
    %cst_30 = arith.constant 2.000000e+00 : f32
    %cst_31 = arith.constant 0.000000e+00 : f32
    %86 = vector.broadcast %cst_30 : f32 to vector<16x128xf32>
    %87 = vector.broadcast %cst_31 : f32 to vector<16x128xf32>
    %88 = arith.select %85, %86, %87 : vector<16x128xi1>, vector<16x128xf32>
    %89 = arith.mulf %53, %88 : vector<16x128xf32>
    %c0_32 = arith.constant 0 : index
    %c0_33 = arith.constant 0 : index
    %90 = vector.load %arg7[%c0_32, %c0_33] : memref<16x128xf32, #tpu.memory_space<vmem>>, vector<16x128xf32>
    tpu.vector_store %arg7[%c0_32, %c0_33], %89 {strides = array<i32>} : memref<16x128xf32, #tpu.memory_space<vmem>>, vector<16x128xf32>,
    return
  }
  func.func @transform_0(%arg0: i32, %arg1: memref<1xi32, #tpu.memory_space<smem>>) -> (i32, i32) {
    %c0_i32 = arith.constant 0 : i32
    %c0_i32_0 = arith.constant 0 : i32
    return %arg0, %c0_i32 : i32, i32
  }
  func.func @transform_1(%arg0: i32, %arg1: memref<1xi32, #tpu.memory_space<smem>>) -> (i32, i32) {
    %c0_i32 = arith.constant 0 : i32
    %c0_i32_0 = arith.constant 0 : i32
    %c0_i32_1 = arith.constant 0 : i32
    return %c0_i32, %c0_i32_0 : i32, i32
  }
  func.func @transform_2(%arg0: i32, %arg1: memref<1xi32, #tpu.memory_space<smem>>) -> (i32, i32) {
    %c0_i32 = arith.constant 0 : i32
    %c0_i32_0 = arith.constant 0 : i32
    %c0_i32_1 = arith.constant 0 : i32
    return %c0_i32, %c0_i32_0 : i32, i32
  }
  func.func @transform_3(%arg0: i32, %arg1: memref<1xi32, #tpu.memory_space<smem>>) -> (i32, i32) {
    %c0_i32 = arith.constant 0 : i32
    %c0_i32_0 = arith.constant 0 : i32
    %c0_i32_1 = arith.constant 0 : i32
    return %c0_i32, %c0_i32_0 : i32, i32
  }
  func.func @transform_4(%arg0: i32, %arg1: memref<1xi32, #tpu.memory_space<smem>>) -> (i32, i32) {
    %c0_i32 = arith.constant 0 : i32
    %c0_i32_0 = arith.constant 0 : i32
    %c0_i32_1 = arith.constant 0 : i32
    return %c0_i32, %c0_i32_0 : i32, i32
  }
  func.func @transform_5(%arg0: i32, %arg1: memref<1xi32, #tpu.memory_space<smem>>) -> (i32, i32) {
    %c0_i32 = arith.constant 0 : i32
    %c0_i32_0 = arith.constant 0 : i32
    return %arg0, %c0_i32 : i32, i32
  }
}

</mosaic_0001>

<bundles_post_ra>
// kernel: tpu_custom_call.1
= control target key start
LH: loop header
LB: loop body
LE: loop exit
PB: predicated region body
PF: predicated region fallthrough
CT: control target
= control target key end

     0   :  { %12 = vsyncpa [#allocation5], 0  ;;  %s678_s0 = inlined_call_operand.<no memory space> [shape: s32[1], index: 0, kind: input, shape index: {}]   ;;  %s679_s1 = inlined_call_operand.hbm [shape: bf16[16,128], index: 1, kind: input, shape index: {}]   ;;  %s680_s2 = inlined_call_operand.hbm [shape: bf16[128,128], index: 2, kind: input, shape index: {}]   ;;  %s681_s3 = inlined_call_operand.vmem [shape: f32[1,128], index: 3, kind: input, shape index: {}]   ;;  %s682_s4 = inlined_call_operand.hbm [shape: bf16[128,128], index: 4, kind: input, shape index: {}]   ;;  %s683_s5 = inlined_call_operand.vmem [shape: f32[1,128], index: 5, kind: input, shape index: {}]   ;;  %s684_s6 = inlined_call_operand.hbm [shape: f32[16,128], index: 6, kind: output, shape index: {}]  }
   0x1   :  { %13 = vsyncpa [#allocation8], 0 }
   0x2   :  { %14 = vsyncpa [#allocation6], 0  ;;  %s587_s21 = smov [#allocation7]   ;;  %s588_s23 = smov [#allocation4]  }
   0x3   :  { %s32_s22 = sshll.u32 %s587_s21, 4  ;;  %s20_s24 = sshll.u32 %s588_s23, 4  ;;  %s33_s22 = int_to_ptr.vmem [resolvable:$true] %s32_s22  ;;  %s21_s24 = int_to_ptr.vmem [resolvable:$true] %s20_s24 }
   0x4   :  { %s509_s25 = scalar_lea.vmem %s33_s22, 1024  ;;  %p514_p1 = scmp.lt.s32.totalorder %s33_s22, %s33_s22 }
   0x5   :  { %p510_p0 = scmp.ne.s32.totalorder %s33_s22, %s509_s25  ;;  %p515_p2 = scmp.lt.s32.totalorder %s509_s25, %s509_s25 }
   0x7   :  { %p516_p3 = por %p515_p2, %p514_p1 }
   0x9   :  { %p517_p4 = pnand %p516_p3, %p510_p0 }
   0xb   :  { %520 = shalt.err (!%p517_p4)
}
   0xc   :  { %s589_s26 = smov 64   ;;  %s590_s27 = smov 4  }
   0xd   :  { %38 = dma.hbm_to_vmem [thread:$0]  %s680_s2, 1024, %s33_s22, [#allocation8], %s589_s26, %s589_s26, %s590_s27  }
   0xe   :  { %s529_s30 = scalar_lea.vmem %s21_s24, 128  ;;  %p534_p6 = scmp.lt.s32.totalorder %s21_s24, %s21_s24 }
   0xf   :  { %p530_p5 = scmp.ne.s32.totalorder %s21_s24, %s529_s30  ;;  %p535_p7 = scmp.lt.s32.totalorder %s529_s30, %s529_s30 }
  0x11   :  { %p536_p8 = por %p535_p7, %p534_p6 }
  0x13   :  { %p537_p9 = pnand %p536_p8, %p530_p5 }
  0x15   :  { %540 = shalt.err (!%p537_p9)
}
  0x16   :  { %26 = dma.hbm_to_vmem [thread:$0]  %s679_s1, 128, %s21_s24, [#allocation5], %s589_s26, %s589_s26, %s590_s27  }
  0x17   :  { %s591_s9 = smov [#allocation9]  }
  0x18   :  { %s46_s10 = sshll.u32 %s591_s9, 4  ;;  %s47_s10 = int_to_ptr.vmem [resolvable:$true] %s46_s10 }
  0x19   :  { %s549_s11 = scalar_lea.vmem %s47_s10, 1024  ;;  %p554_p11 = scmp.lt.s32.totalorder %s47_s10, %s47_s10 }
  0x1a   :  { %p550_p10 = scmp.ne.s32.totalorder %s47_s10, %s549_s11  ;;  %p555_p12 = scmp.lt.s32.totalorder %s549_s11, %s549_s11 }
  0x1c   :  { %p556_p13 = por %p555_p12, %p554_p11 }
  0x1e   :  { %p557_p0 = pnand %p556_p13, %p550_p10 }
  0x20   :  { %560 = shalt.err (!%p557_p0)
}
  0x21   :  { %52 = dma.hbm_to_vmem [thread:$0]  %s682_s4, 1024, %s47_s10, [#allocation8], %s589_s26, %s589_s26, %s590_s27  }
  0x22   :  { %581 = dma.done.wait [#allocation5], 128  }
  0x23   :  { %582 = vsyncadd [#allocation5], 4294967168 }
  0x24   :  { %583 = dma.done.wait [#allocation8], 2048  }
  0x25   :  { %584 = vsyncadd [#allocation8], 4294965248  ;;  %v592_v0 = vmov 0.0   ;;  %vm593_vm0 = vmmov 0   ;;  %v484_v1 = vld [vmem:[#allocation7 + $0x38] sm:$0xff]   ;;  %v485_v2 = vld [vmem:[#allocation7 + $0x30] sm:$0xff]   ;;  %v189_v18 = vlaneseq }
  0x26   :  { %434 = vmatprep.subr.bf16.mxu0 %v592_v0  ;;  %450 = vmatprep.mubr.msk.bf16.mxu0 %vm593_vm0, %v592_v0  ;;  %v486_v3 = vld [vmem:[#allocation7 + $0x28] sm:$0xff]   ;;  %v493_v4 = vld [vmem:[#allocation9 + $0x38] sm:$0xff]   ;;  %v487_v5 = vld [vmem:[#allocation7 + $0x20] sm:$0xff]   ;;  %s202_s13 = sxor.u32 2654435761, %s678_s0  ;;  %s594_s19 = smov [#allocation10]  }
  0x27   :  { %454 = vmatprep.subr.bf16.mxu1 %v592_v0  ;;  %470 = vmatprep.mubr.msk.bf16.mxu1 %vm593_vm0, %v592_v0  ;;  %v494_v6 = vld [vmem:[#allocation9 + $0x30] sm:$0xff]   ;;  %v488_v7 = vld [vmem:[#allocation7 + $0x18] sm:$0xff]   ;;  %v495_v8 = vld [vmem:[#allocation9 + $0x28] sm:$0xff]   ;;  %v190_v19 = vshrl.u32 %v189_v18, 7  ;;  %v193_v20 = vand.u32 127, %v189_v18  ;;  %v203_v27 = vstv %s202_s13  ;;  %s384_s20 = sshll.u32 %s594_s19, 4  ;;  %s385_s20 = int_to_ptr.vmem [resolvable:$true] %s384_s20 }
  0x28   :  { %435 = vmatpush3.bf16.msra.mxu0 %v484_v1  ;;  %455 = vmatpush3.bf16.msra.mxu1 %v493_v4  ;;  %v489_v9 = vld [vmem:[#allocation7 + $0x10] sm:$0xff]   ;;  %v496_v10 = vld [vmem:[#allocation9 + $0x20] sm:$0xff]   ;;  %v490_v11 = vld [vmem:[#allocation7 + $0x8] sm:$0xff]   ;;  %s347_s17 = sxor.u32 1013904226, %s678_s0  ;;  %p566_p2 = scmp.lt.s32.totalorder %s385_s20, %s385_s20 }
  0x29   :  { %436 = vmatprep.subr.bf16.mxu0 %v592_v0  ;;  %456 = vmatprep.subr.bf16.mxu1 %v592_v0  ;;  %v497_v12 = vld [vmem:[#allocation9 + $0x18] sm:$0xff]   ;;  %v491_v13 = vld [vmem:[#allocation7] sm:$0xff]   ;;  %v498_v15 = vld [vmem:[#allocation9 + $0x10] sm:$0xff]   ;;  %v191_v21 = vadd.s32 8, %v190_v19  ;;  %v197_v22 = vmul.u32 2246822519, %v190_v19  ;;  %v348_v1 = vstv %s347_s17 }
  0x2a   :  { %v492_v14 = vld [vmem:[#allocation4] sm:$0xff]   ;;  %v499_v16 = vld [vmem:[#allocation9 + $0x8] sm:$0xff]   ;;  %v500_v17 = vld [vmem:[#allocation9] sm:$0xff]   ;;  %v199_v23 = vmul.u32 3266489917, %v193_v20 }
  0x2b   :  { %v198_v24 = vmul.u32 2246822519, %v191_v21  ;;  %v397_v48 = vld [vmem:[%s681_s3] ss:$0 sm:$0xff] }
  0x2c   :  { %437 = vmatpush3.bf16.msra.mxu0 %v485_v2  ;;  %457 = vmatpush3.bf16.msra.mxu1 %v494_v6  ;;  %v200_v25 = vadd.s32 %v199_v23, %v197_v22 }
  0x2d   :  { %438 = vmatprep.subr.bf16.mxu0 %v592_v0  ;;  %458 = vmatprep.subr.bf16.mxu1 %v592_v0  ;;  %v201_v26 = vadd.s32 %v199_v23, %v198_v24  ;;  %v407_v23 = vld [vmem:[%s683_s5] ss:$0 sm:$0xff]  ;;  %s561_s5 = scalar_lea.vmem %s385_s20, 256 }
  0x2e   :  { %v204_v28 = vadd.s32 %v203_v27, %v200_v25  ;;  %v349_v2 = vadd.s32 %v348_v1, %v200_v25  ;;  %p562_p1 = scmp.ne.s32.totalorder %s385_s20, %s561_s5  ;;  %p567_p3 = scmp.lt.s32.totalorder %s561_s5, %s561_s5 }
  0x2f   :  { %v205_v29 = vadd.s32 %v203_v27, %v201_v26  ;;  %v350_v4 = vadd.s32 %v348_v1, %v201_v26 }
  0x30   :  { %439 = vmatpush3.bf16.msra.mxu0 %v486_v3  ;;  %459 = vmatpush3.bf16.msra.mxu1 %v495_v8  ;;  %v206_v30 = vshrl.u32 %v204_v28, 16  ;;  %v351_v3 = vshrl.u32 %v349_v2, 16  ;;  %p568_p4 = por %p567_p3, %p566_p2 }
  0x31   :  { %440 = vmatprep.subr.bf16.mxu0 %v592_v0  ;;  %460 = vmatprep.subr.bf16.mxu1 %v592_v0  ;;  %v207_v31 = vshrl.u32 %v205_v29, 16  ;;  %v352_v6 = vshrl.u32 %v350_v4, 16 }
  0x32   :  { %v208_v32 = vxor.u32 %v206_v30, %v204_v28  ;;  %p569_p5 = pnand %p568_p4, %p562_p1 }
  0x33   :  { %v209_v33 = vxor.u32 %v207_v31, %v205_v29  ;;  %v354_v8 = vxor.u32 %v352_v6, %v350_v4 }
  0x34   :  { %441 = vmatpush3.bf16.msra.mxu0 %v487_v5  ;;  %461 = vmatpush3.bf16.msra.mxu1 %v496_v10  ;;  %v210_v34 = vmul.u32 2246822507, %v208_v32  ;;  %v353_v5 = vxor.u32 %v351_v3, %v349_v2 }
  0x35   :  { %442 = vmatprep.subr.bf16.mxu0 %v592_v0  ;;  %462 = vmatprep.subr.bf16.mxu1 %v592_v0  ;;  %v211_v35 = vmul.u32 2246822507, %v209_v33  ;;  %v356_v10 = vmul.u32 2246822507, %v354_v8 }
  0x36   :  { %v212_v36 = vshrl.u32 %v210_v34, 13 }
  0x37   :  { %v213_v37 = vshrl.u32 %v211_v35, 13 }
  0x38   :  { %443 = vmatpush3.bf16.msra.mxu0 %v488_v7  ;;  %463 = vmatpush3.bf16.msra.mxu1 %v497_v12  ;;  %v214_v38 = vxor.u32 %v212_v36, %v210_v34  ;;  %v355_v7 = vmul.u32 2246822507, %v353_v5  ;;  %v358_v12 = vshrl.u32 %v356_v10, 13 }
  0x39   :  { %444 = vmatprep.subr.bf16.mxu0 %v592_v0  ;;  %464 = vmatprep.subr.bf16.mxu1 %v592_v0  ;;  %v215_v39 = vxor.u32 %v213_v37, %v211_v35 }
  0x3a   :  { %v216_v40 = vmul.u32 3266489909, %v214_v38 }
  0x3b   :  { %v217_v41 = vmul.u32 3266489909, %v215_v39 }
  0x3c   :  { %445 = vmatpush3.bf16.msra.mxu0 %v489_v9  ;;  %465 = vmatpush3.bf16.msra.mxu1 %v498_v15  ;;  %v218_v42 = vshrl.u32 %v216_v40, 16  ;;  %v357_v9 = vshrl.u32 %v355_v7, 13 }
  0x3d   :  { %446 = vmatprep.subr.bf16.mxu0 %v592_v0  ;;  %466 = vmatprep.subr.bf16.mxu1 %v592_v0  ;;  %v219_v43 = vshrl.u32 %v217_v41, 16 }
  0x3e   :  { %v220_v44 = vxor.u32 %v218_v42, %v216_v40 }
  0x3f   :  { %v221_v45 = vxor.u32 %v219_v43, %v217_v41 }
  0x40   :  { %447 = vmatpush3.bf16.msra.mxu0 %v490_v11  ;;  %467 = vmatpush3.bf16.msra.mxu1 %v499_v16  ;;  %v222_v46 = vshrl.u32 %v220_v44, 17  ;;  %v359_v11 = vxor.u32 %v357_v9, %v355_v7 }
  0x41   :  { %448 = vmatprep.subr.bf16.mxu0 %v592_v0  ;;  %468 = vmatprep.subr.bf16.mxu1 %v592_v0  ;;  %v223_v47 = vshrl.u32 %v221_v45, 17 }
  0x42   :  { %v224_v49 = vand.u32 1, %v222_v46 }
  0x43   :  { %v225_v50 = vand.u32 1, %v223_v47 }
  0x44   :  { %449 = vmatpush3.bf16.msra.mxu0 %v491_v13  ;;  %469 = vmatpush3.bf16.msra.mxu1 %v500_v17  ;;  %vm226_vm1 = vcmp.eq.s32.totalorder %v224_v49, 1  ;;  %v361_v13 = vmul.u32 3266489909, %v359_v11 }
  0x45   :  { %vm227_vm2 = vcmp.eq.s32.totalorder %v225_v50, 1  ;;  %v228_v57 = vsel %vm226_vm1, 2.0, %v592_v0 }
  0x46   :  { %v229_v58 = vsel %vm227_vm2, 2.0, %v592_v0  ;;  %v363_v15 = vshrl.u32 %v361_v13, 16 }
  0x47   :  { %451 = vmatmul.mubr.bf16.vlgmr.msra.gmra.mxu0 %v492_v14  ;;  %v360_v14 = vxor.u32 %v358_v12, %v356_v10 }
  0x48   :  { %v365_v17 = vxor.u32 %v363_v15, %v361_v13 }
  0x49   :  { %v362_v16 = vmul.u32 3266489909, %v360_v14 }
  0x4a   :  { %v367_v19 = vshrl.u32 %v365_v17, 17 }
  0x4b   :  { %v364_v18 = vshrl.u32 %v362_v16, 16 }
  0x4c   :  { %v369_v21 = vand.u32 1, %v367_v19 }
  0x4d   :  { %v366_v20 = vxor.u32 %v364_v18, %v362_v16 }
  0x4e   :  { %vm371_vm3 = vcmp.eq.s32.totalorder %v369_v21, 1 }
  0x4f   :  { %v368_v22 = vshrl.u32 %v366_v20, 17  ;;  %v373_v27 = vsel %vm371_vm3, 2.0, %v592_v0 }
  0x51   :  { %v370_v24 = vand.u32 1, %v368_v22 }
  0x53   :  { %vm372_vm4 = vcmp.eq.s32.totalorder %v370_v24, 1 }
  0x54   :  { %v374_v33 = vsel %vm372_vm4, 2.0, %v592_v0 }
 0x107   :  { %v180_v51 = vpop.f32.mrf.mxu0 }
 0x108   :  { %v181_v52 = vadd.f32 %v397_v48, %v180_v51 }
 0x109   :  { %v452_v53 = vpop.f32.mrf.mxu0 }
 0x10a   :  { %v187_v55 = vmax.f32 %v181_v52, 0.0 }
 0x10b   :  { %v183_v54 = vpop.f32.mrf.mxu0 }
 0x10c   :  { %v184_v56 = vadd.f32 %v397_v48, %v183_v54  ;;  %v230_v61 = vmul.f32 %v228_v57, %v187_v55 }
 0x10d   :  { %v453_v59 = vpop.f32.mrf.mxu0 }
 0x10e   :  { %v188_v60 = vmax.f32 %v184_v56, 0.0 }
 0x110   :  { %v231_v62 = vmul.f32 %v229_v58, %v188_v60 }
 0x112   :  { %v232_v63 = vpack.c.bf16 %v231_v62, %v230_v61 }
 0x114   :  { %471 = vmatmul.mubr.bf16.vlgmr.msra.gmra.mxu1 %v232_v63 }
 0x1d4   :  { %v338_v25 = vpop.f32.mrf.mxu1 }
 0x1d5   :  { %v339_v26 = vadd.f32 %v407_v23, %v338_v25 }
 0x1d6   :  { %v472_v28 = vpop.f32.mrf.mxu1 }
 0x1d7   :  { %v345_v29 = vmax.f32 %v339_v26, 0.0 }
 0x1d8   :  { %v341_v30 = vpop.f32.mrf.mxu1 }
 0x1d9   :  { %v375_v31 = vmul.f32 %v373_v27, %v345_v29  ;;  %v342_v32 = vadd.f32 %v407_v23, %v341_v30 }
 0x1da   :  { %v473_v34 = vpop.f32.mrf.mxu1 }
 0x1db   :  { %377 = vst [vmem:[#allocation10] sm:$0xff] %v375_v31  ;;  %v346_v35 = vmax.f32 %v342_v32, 0.0 }
 0x1dd   :  { %v376_v36 = vmul.f32 %v374_v33, %v346_v35 }
 0x1df   :  { %378 = vst [vmem:[#allocation10 + $0x8] sm:$0xff] %v376_v36 }
 0x1e0   :  { %572 = shalt.err (!%p569_p5)
}
 0x1e1   :  { %s595_s21 = smov 128   ;;  %s596_s22 = smov 8  }
 0x1e2   :  { %390 = dma.vmem_to_hbm [thread:$0]  %s385_s20, 256, %s684_s6, [#allocation6], %s595_s21, %s595_s21, %s596_s22  }
 0x1e3   :  { %585 = dma.done.wait [#allocation6], 256  }
 0x1e4   :  { %586 = vsyncadd [#allocation6], 4294967040 }
 0x1e5   :  { %394 = vsyncpa [#allocation5], 1 }
 0x1e6   :  { %395 = vsyncpa [#allocation8], 1 }
 0x1e7   :  { %396 = vsyncpa [#allocation6], 1 }

</bundles_post_ra>
